<compile_context>
chip_gen: v6e
topology: v6e:2x2x1
jax: 0.10.0
libtpu: 0.0.40
codegen_flags: <defaults>
</compile_context>

<pallas_src>
import functools

import jax
import jax.numpy as jnp
from jax.experimental import pallas as pl
from jax.experimental.pallas import tpu as pltpu


def _round_up(x, m):
    return (x + m - 1) // m * m


def _mpnn_kernel(x_ref, a_ref, w_ref, b_ref, o_ref, *, k, neg_slope):
    """One grid step == one block of Bt batch elements.

    x_ref: (Bt, Np, Dip)   node features (zero padded)
    a_ref: (Bt, Np, Np)    adjacency (zero padded)
    w_ref: (k*Dip, Dop)    hop weights stacked along the contraction dim
    b_ref: (1, Dop)        pre-summed bias (f32)
    o_ref: (Bt, Np, Dop)
    """
    bt, n_p, d_ip = x_ref.shape
    d_op = o_ref.shape[-1]

    a = a_ref[...]                      # native dtype -> full MXU rate for bf16
    h = x_ref[...]

    # Iterative propagation: A^kk X == A @ (A^{kk-1} X); A^k never materialized.
    hops = []
    for _ in range(k):                  # k is small & static -> fully unrolled
        h32 = jnp.einsum("bij,bjd->bid", a, h,
                         preferred_element_type=jnp.float32)
        h = h32.astype(x_ref.dtype)     # keep MXU operands in native dtype
        hops.append(h)

    # Fuse the k Linear layers into ONE matmul:
    #   sum_k H_k @ W_k^T  ==  concat_k(H_k) @ concat_k(W_k^T)
    h_cat = jnp.concatenate(hops, axis=-1)             # (Bt, Np, k*Dip)
    h2 = h_cat.reshape(bt * n_p, k * d_ip)             # fold batch into MXU M
    out = jnp.dot(h2, w_ref[...],
                  preferred_element_type=jnp.float32)  # (Bt*Np, Dop) f32
    out = out + b_ref[...]                             # single pre-summed bias
    out = jnp.where(out > 0, out, neg_slope * out)     # leaky_relu, slope 0.01
    o_ref[...] = out.reshape(bt, n_p, d_op).astype(o_ref.dtype)


def mpnn_mk_forward(X, A, W, bias, *, k, block_b=None):
    """MPNN_mk forward.

    X: (B, N, D_in), A: (B, N, N),
    W: (k, D_out, D_in)  (PyTorch nn.Linear weight layout), bias: (k, D_out).
    Returns (B, N, D_out) = leaky_relu( sum_k (A^{kk+1} X) W_k^T + b_k ).
    """
    B, N, D_in = X.shape
    D_out = W.shape[1]
    itemsize = jnp.dtype(X.dtype).itemsize

    # ---- TPU-friendly padding: lane dims -> x128, sublane -> x8 -----------
    Np = _round_up(N, 8)
    Dip = _round_up(D_in, 128)
    Dop = _round_up(D_out, 128)

    # ---- batch block so double-buffered per-step tiles stay well in VMEM ---
    if block_b is None:
        per_b = (2 * (Np * Np + Np * Dip + Np * Dop) * itemsize
                 + Np * k * Dip * 4)              # f32 hop intermediates
        budget = 16 * 1024 * 1024
        block_b = int(max(1, min(B, budget // max(per_b, 1))))
    block_b = int(block_b)
    Bp = _round_up(B, block_b)

    X_p = jnp.zeros((Bp, Np, Dip), X.dtype).at[:B, :N, :D_in].set(X)
    A_p = jnp.zeros((Bp, Np, Np), A.dtype).at[:B, :N, :N].set(A)

    # W (k, D_out, D_in) -> transpose/pad to (k, Dip, Dop) -> stack to (k*Dip, Dop)
    W_t = jnp.transpose(W, (0, 2, 1))
    W_cat = (jnp.zeros((k, Dip, Dop), W.dtype)
             .at[:, :D_in, :D_out].set(W_t)
             .reshape(k * Dip, Dop))
    # Per-hop biases are added before the hop-sum -> they simply add up.
    b_sum = (jnp.zeros((1, Dop), jnp.float32)
             .at[0, :D_out].set(bias.astype(jnp.float32).sum(0)))

    kernel = functools.partial(_mpnn_kernel, k=k, neg_slope=0.01)

    flops = 2 * Bp * (k * Np * Np * Dip + Np * (k * Dip) * Dop)
    bytes_accessed = ((X_p.size + A_p.size) * itemsize
                      + W_cat.size * jnp.dtype(W_cat.dtype).itemsize
                      + b_sum.size * 4
                      + Bp * Np * Dop * itemsize)

    out_p = pl.pallas_call(
        kernel,
        out_shape=jax.ShapeDtypeStruct((Bp, Np, Dop), X.dtype),
        grid_spec=pltpu.PrefetchScalarGridSpec(
            num_scalar_prefetch=0,
            grid=(Bp // block_b,),
            in_specs=[
                pl.BlockSpec((block_b, Np, Dip), lambda b: (b, 0, 0)),  # X block
                pl.BlockSpec((block_b, Np, Np), lambda b: (b, 0, 0)),   # A block
                pl.BlockSpec((k * Dip, Dop), lambda b: (0, 0)),         # weights
                pl.BlockSpec((1, Dop), lambda b: (0, 0)),               # bias
            ],
            out_specs=pl.BlockSpec((block_b, Np, Dop), lambda b: (b, 0, 0)),
        ),
        compiler_params=pltpu.CompilerParams(
            dimension_semantics=("parallel",),
            vmem_limit_bytes=64 * 1024 * 1024,
        ),
        cost_estimate=pl.CostEstimate(
            flops=int(flops),
            transcendentals=0,
            bytes_accessed=int(bytes_accessed)),
    )(X_p, A_p, W_cat, b_sum)

    return out_p[:B, :N, :D_out]


def _reference(X, A, W, bias, *, k):
    """Pure-JAX reference mirroring the PyTorch forward."""
    outs = []
    A_ = None
    for kk in range(k):
        A_ = A if kk == 0 else jnp.einsum("bij,bjk->bik", A_, A)
        AX = jnp.einsum("bij,bjd->bid", A_, X)
        outs.append(jnp.einsum("bnd,od->bno", AX, W[kk]) + bias[kk])
    s = sum(outs)
    return jnp.where(s > 0, s, 0.01 * s)


if __name__ == "__main__":
    key = jax.random.PRNGKey(0)
    B, N, D_in, D_out, k = 2, 16, 8, 32, 2

    k1, k2, k3, k4 = jax.random.split(key, 4)
    X = jax.random.normal(k1, (B, N, D_in), jnp.float32)
    A = jax.random.uniform(k2, (B, N, N), jnp.float32)
    # "Linear" params: W[kk] is (D_out, D_in), bias[kk] is (D_out,)
    W = 0.1 * jax.random.normal(k3, (k, D_out, D_in), jnp.float32)
    bias = 0.1 * jax.random.normal(k4, (k, D_out), jnp.float32)

    out = mpnn_mk_forward(X, A, W, bias, k=k)
    out = jax.block_until_ready(out)

    ref = _reference(X, A, W, bias, k=k)
    assert out.shape == (B, N, D_out)
    assert jnp.allclose(out, ref, atol=1e-3, rtol=1e-3), float(
        jnp.max(jnp.abs(out - ref)))

    print("KERNEL_OK")
</pallas_src>

<mosaic_0001>
module attributes {stable_mosaic.version = 11 : i64} {
  func.func @_mpnn_kernel(%arg0: i32, %arg1: memref<2x16x128xf32, #tpu.memory_space<vmem>>, %arg2: memref<2x16x16xf32, #tpu.memory_space<vmem>>, %arg3: memref<256x128xf32, #tpu.memory_space<vmem>>, %arg4: memref<1x128xf32, #tpu.memory_space<vmem>>, %arg5: memref<2x16x128xf32, #tpu.memory_space<vmem>>) attributes {dimension_semantics = [#tpu.dimension_semantics<parallel>], iteration_bounds = array<i64: 1>, scalar_prefetch = 0 : i64, scratch_operands = 0 : i64, tpu.core_type = #tpu.core_type<tc>, window_params = [{transform_indices = @transform_0, window_bounds = array<i64: 2, 16, 128>}, {transform_indices = @transform_1, window_bounds = array<i64: 2, 16, 16>}, {pipeline_mode = #tpu.pipeline_mode<synchronous>, transform_indices = @transform_2, window_bounds = array<i64: 256, 128>}, {pipeline_mode = #tpu.pipeline_mode<synchronous>, transform_indices = @transform_3, window_bounds = array<i64: 1, 128>}, {transform_indices = @transform_4, window_bounds = array<i64: 2, 16, 128>}]} {
    %c0 = arith.constant 0 : index
    %c0_0 = arith.constant 0 : index
    %c0_1 = arith.constant 0 : index
    %0 = vector.load %arg2[%c0, %c0_0, %c0_1] : memref<2x16x16xf32, #tpu.memory_space<vmem>>, vector<2x16x16xf32>
    %c0_2 = arith.constant 0 : index
    %c0_3 = arith.constant 0 : index
    %c0_4 = arith.constant 0 : index
    %1 = vector.load %arg1[%c0_2, %c0_3, %c0_4] : memref<2x16x128xf32, #tpu.memory_space<vmem>>, vector<2x16x128xf32>
    "tpu.trace_start"() <{level = 10 : i32, message = "bij,bjd->bid"}> : () -> ()
    %cst = arith.constant dense<0.000000e+00> : vector<2x16x128xf32>
    %2 = tpu.matmul %0, %1, %cst {dimension_numbers = #tpu.dot_dimension_numbers<[2], [1], [1], [2], [0, 0, 0, 1, 1, 2], [0], [0]>} : vector<2x16x16xf32>, vector<2x16x128xf32>, vector<2x16x128xf32> -> vector<2x16x128xf32>
    %cst_5 = arith.constant dense<0.000000e+00> : vector<2x16x128xf32>
    %3 = tpu.matmul %0, %2, %cst_5 {dimension_numbers = #tpu.dot_dimension_numbers<[2], [1], [1], [2], [0, 0, 0, 1, 1, 2], [0], [0]>} : vector<2x16x16xf32>, vector<2x16x128xf32>, vector<2x16x128xf32> -> vector<2x16x128xf32>
    "tpu.trace_stop"() : () -> ()
    %4 = tpu.concatenate %2, %3 in 2 : vector<2x16x128xf32>, vector<2x16x128xf32> -> vector<2x16x256xf32>
    %5 = vector.shape_cast %4 : vector<2x16x256xf32> to vector<32x256xf32>
    %c0_6 = arith.constant 0 : index
    %c0_7 = arith.constant 0 : index
    %6 = vector.load %arg3[%c0_6, %c0_7] : memref<256x128xf32, #tpu.memory_space<vmem>>, vector<256x128xf32>
    %cst_8 = arith.constant dense<0.000000e+00> : vector<32x128xf32>
    %7 = tpu.matmul %5, %6, %cst_8 {dimension_numbers = #tpu.dot_dimension_numbers<[1], [0], [0], [1], [0, 0, 1, 1], [], []>} : vector<32x256xf32>, vector<256x128xf32>, vector<32x128xf32> -> vector<32x128xf32>
    %c0_9 = arith.constant 0 : index
    %c0_10 = arith.constant 0 : index
    %8 = vector.load %arg4[%c0_9, %c0_10] : memref<1x128xf32, #tpu.memory_space<vmem>>, vector<1x128xf32>
    %9 = vector.broadcast %8 : vector<1x128xf32> to vector<32x128xf32>
    %10 = arith.addf %7, %9 : vector<32x128xf32>
    %cst_11 = arith.constant 0.000000e+00 : f32
    %11 = vector.broadcast %cst_11 : f32 to vector<32x128xf32>
    %12 = arith.cmpf ogt, %10, %11 : vector<32x128xf32>
    %cst_12 = arith.constant 0.00999999977 : f32
    %13 = vector.broadcast %cst_12 : f32 to vector<32x128xf32>
    %14 = arith.mulf %13, %10 : vector<32x128xf32>
    %15 = arith.select %12, %10, %14 : vector<32x128xi1>, vector<32x128xf32>
    %16 = vector.shape_cast %15 : vector<32x128xf32> to vector<2x16x128xf32>
    %c0_13 = arith.constant 0 : index
    %c0_14 = arith.constant 0 : index
    %c0_15 = arith.constant 0 : index
    %17 = vector.load %arg5[%c0_13, %c0_14, %c0_15] : memref<2x16x128xf32, #tpu.memory_space<vmem>>, vector<2x16x128xf32>
    tpu.vector_store %arg5[%c0_13, %c0_14, %c0_15], %16 {strides = array<i32>} : memref<2x16x128xf32, #tpu.memory_space<vmem>>, vector<2x16x128xf32>,
    return
  }
  func.func @transform_0(%arg0: i32) -> (i32, i32, i32) {
    %c0_i32 = arith.constant 0 : i32
    %c0_i32_0 = arith.constant 0 : i32
    %c0_i32_1 = arith.constant 0 : i32
    return %arg0, %c0_i32, %c0_i32_0 : i32, i32, i32
  }
  func.func @transform_1(%arg0: i32) -> (i32, i32, i32) {
    %c0_i32 = arith.constant 0 : i32
    %c0_i32_0 = arith.constant 0 : i32
    %c0_i32_1 = arith.constant 0 : i32
    return %arg0, %c0_i32, %c0_i32_0 : i32, i32, i32
  }
  func.func @transform_2(%arg0: i32) -> (i32, i32) {
    %c0_i32 = arith.constant 0 : i32
    %c0_i32_0 = arith.constant 0 : i32
    %c0_i32_1 = arith.constant 0 : i32
    return %c0_i32, %c0_i32_0 : i32, i32
  }
  func.func @transform_3(%arg0: i32) -> (i32, i32) {
    %c0_i32 = arith.constant 0 : i32
    %c0_i32_0 = arith.constant 0 : i32
    %c0_i32_1 = arith.constant 0 : i32
    return %c0_i32, %c0_i32_0 : i32, i32
  }
  func.func @transform_4(%arg0: i32) -> (i32, i32, i32) {
    %c0_i32 = arith.constant 0 : i32
    %c0_i32_0 = arith.constant 0 : i32
    %c0_i32_1 = arith.constant 0 : i32
    return %arg0, %c0_i32, %c0_i32_0 : i32, i32, i32
  }
}

</mosaic_0001>

<bundles_post_ra>
// kernel: tpu_custom_call.1
= control target key start
LH: loop header
LB: loop body
LE: loop exit
PB: predicated region body
PF: predicated region fallthrough
CT: control target
= control target key end

     0   :  { %9 = vsyncpa [#allocation3], 0  ;;  %s845_s0 = inlined_call_operand.hbm [shape: f32[2,16,128], index: 0, kind: input, shape index: {}]   ;;  %s846_s1 = inlined_call_operand.hbm [shape: f32[2,16,16], index: 1, kind: input, shape index: {}]   ;;  %s847_s2 = inlined_call_operand.hbm [shape: f32[256,128], index: 2, kind: input, shape index: {}]   ;;  %s848_s3 = inlined_call_operand.vmem [shape: f32[1,128], index: 3, kind: input, shape index: {}]   ;;  %s849_s4 = inlined_call_operand.hbm [shape: f32[2,16,128], index: 4, kind: output, shape index: {}]  }
   0x1   :  { %10 = vsyncpa [#allocation6], 0 }
   0x2   :  { %11 = vsyncpa [#allocation4], 0  ;;  %s759_s15 = smov [#allocation5]   ;;  %s760_s17 = smov [#allocation2]  }
   0x3   :  { %s29_s16 = sshll.u32 %s759_s15, 4  ;;  %s17_s18 = sshll.u32 %s760_s17, 4  ;;  %s30_s16 = int_to_ptr.vmem [resolvable:$true] %s29_s16  ;;  %s18_s18 = int_to_ptr.vmem [resolvable:$true] %s17_s18 }
   0x4   :  { %s681_s19 = scalar_lea.vmem %s30_s16, 512  ;;  %p686_p1 = scmp.lt.s32.totalorder %s30_s16, %s30_s16 }
   0x5   :  { %p682_p0 = scmp.ne.s32.totalorder %s30_s16, %s681_s19  ;;  %p687_p2 = scmp.lt.s32.totalorder %s681_s19, %s681_s19 }
   0x7   :  { %p688_p3 = por %p687_p2, %p686_p1 }
   0x9   :  { %p689_p4 = pnand %p688_p3, %p682_p0 }
   0xb   :  { %692 = shalt.err (!%p689_p4)
}
   0xc   :  { %s761_s20 = smov 128   ;;  %s762_s21 = smov 8  }
   0xd   :  { %35 = dma.hbm_to_vmem [thread:$0]  %s846_s1, 512, %s30_s16, [#allocation6], %s761_s20, %s761_s20, %s762_s21  }
   0xe   :  { %s701_s24 = scalar_lea.vmem %s18_s18, 512  ;;  %p706_p6 = scmp.lt.s32.totalorder %s18_s18, %s18_s18 }
   0xf   :  { %p702_p5 = scmp.ne.s32.totalorder %s18_s18, %s701_s24  ;;  %p707_p7 = scmp.lt.s32.totalorder %s701_s24, %s701_s24 }
  0x11   :  { %p708_p8 = por %p707_p7, %p706_p6 }
  0x13   :  { %p709_p9 = pnand %p708_p8, %p702_p5 }
  0x15   :  { %712 = shalt.err (!%p709_p9)
}
  0x16   :  { %23 = dma.hbm_to_vmem [thread:$0]  %s845_s0, 512, %s18_s18, [#allocation3], %s761_s20, %s761_s20, %s762_s21  }
  0x17   :  { %s763_s27 = smov [#allocation7]  }
  0x18   :  { %s41_s28 = sshll.u32 %s763_s27, 4  ;;  %s42_s28 = int_to_ptr.vmem [resolvable:$true] %s41_s28 }
  0x19   :  { %s721_s29 = scalar_lea.vmem %s42_s28, 4096  ;;  %p726_p11 = scmp.lt.s32.totalorder %s42_s28, %s42_s28 }
  0x1a   :  { %p722_p10 = scmp.ne.s32.totalorder %s42_s28, %s721_s29  ;;  %p727_p12 = scmp.lt.s32.totalorder %s721_s29, %s721_s29 }
  0x1c   :  { %p728_p13 = por %p727_p12, %p726_p11 }
  0x1e   :  { %p729_p0 = pnand %p728_p13, %p722_p10 }
  0x20   :  { %732 = shalt.err (!%p729_p0)
}
  0x21   :  { %47 = dma.hbm_to_vmem [thread:$0]  %s847_s2, 4096, %s42_s28, [#allocation6], %s761_s20, %s761_s20, %s762_s21  }
  0x22   :  { %753 = dma.done.wait [#allocation3], 512  }
  0x23   :  { %754 = vsyncadd [#allocation3], 4294966784 }
  0x24   :  { %755 = dma.done.wait [#allocation6], 4608  }
  0x25   :  { %756 = vsyncadd [#allocation6], 4294962688  ;;  %v64_v0 = vld [vmem:[#allocation2 + $0x8] sm:$0xff]  ;;  %v66_v1 = vld [vmem:[#allocation2 + $0x18] sm:$0xff]  ;;  %vm67_vm0 = vcmask 130048  }
  0x26   :  { %v63_v2 = vld [vmem:[#allocation2] sm:$0xff]  ;;  %607 = vmatprep.subr.mxu0 %v64_v0  ;;  %614 = vmatprep.subr.mxu1 %v66_v1  ;;  %v65_v3 = vld [vmem:[#allocation2 + $0x10] sm:$0xff]  ;;  %v60_v6 = vld [vmem:[#allocation5 + $0x8] sm:$0xff] }
  0x27   :  { %v59_v4 = vld [vmem:[#allocation5] sm:$0xff]  ;;  %608 = vmatpush3.msra.mxu0 %v64_v0  ;;  %615 = vmatpush3.msra.mxu1 %v66_v1  ;;  %v61_v5 = vld [vmem:[#allocation5 + $0x10] sm:$0xff]  ;;  %v62_v7 = vld [vmem:[#allocation5 + $0x18] sm:$0xff] }
  0x28   :  { %609 = vmatprep.subr.mxu0 %v63_v2  ;;  %616 = vmatprep.subr.mxu1 %v65_v3  ;;  %v411_v12 = vld [vmem:[#allocation7 + $0xf8] sm:$0xff]  ;;  %v410_v14 = vld [vmem:[#allocation7 + $0xf0] sm:$0xff]  ;;  %v409_v16 = vld [vmem:[#allocation7 + $0xe8] sm:$0xff] }
  0x29   :  { %610 = vmatpush3.msra.mxu0 %v63_v2  ;;  %611 = vmatprep.mubr.msk.f32.mxu0 %vm67_vm0, %v59_v4  ;;  %v395_v13 = vld [vmem:[#allocation7 + $0x78] sm:$0xff]  ;;  %v394_v15 = vld [vmem:[#allocation7 + $0x70] sm:$0xff]  ;;  %v393_v17 = vld [vmem:[#allocation7 + $0x68] sm:$0xff] }
  0x2a   :  { %617 = vmatpush3.msra.mxu1 %v65_v3  ;;  %618 = vmatprep.mubr.msk.f32.mxu1 %vm67_vm0, %v61_v5  ;;  %v408_v18 = vld [vmem:[#allocation7 + $0xe0] sm:$0xff]  ;;  %v407_v20 = vld [vmem:[#allocation7 + $0xd8] sm:$0xff]  ;;  %v406_v22 = vld [vmem:[#allocation7 + $0xd0] sm:$0xff] }
  0x2b   :  { %612 = vmatmul.mubr.msk.f32.vlgmr.msra.gmra.mxu0 %vm67_vm0, %v60_v6  ;;  %619 = vmatmul.mubr.msk.f32.vlgmr.msra.gmra.mxu1 %vm67_vm0, %v62_v7  ;;  %v392_v19 = vld [vmem:[#allocation7 + $0x60] sm:$0xff]  ;;  %v391_v21 = vld [vmem:[#allocation7 + $0x58] sm:$0xff]  ;;  %v390_v23 = vld [vmem:[#allocation7 + $0x50] sm:$0xff] }
  0x2c   :  { %625 = vmatprep.mubr.msk.f32.mxu0 %vm67_vm0, %v59_v4  ;;  %632 = vmatprep.mubr.msk.f32.mxu1 %vm67_vm0, %v61_v5  ;;  %v405_v24 = vld [vmem:[#allocation7 + $0xc8] sm:$0xff]  ;;  %v404_v26 = vld [vmem:[#allocation7 + $0xc0] sm:$0xff]  ;;  %v403_v28 = vld [vmem:[#allocation7 + $0xb8] sm:$0xff] }
  0x2d   :  { %v389_v25 = vld [vmem:[#allocation7 + $0x48] sm:$0xff]  ;;  %v388_v27 = vld [vmem:[#allocation7 + $0x40] sm:$0xff]  ;;  %v387_v29 = vld [vmem:[#allocation7 + $0x38] sm:$0xff] }
  0x2e   :  { %v402_v30 = vld [vmem:[#allocation7 + $0xb0] sm:$0xff]  ;;  %v401_v32 = vld [vmem:[#allocation7 + $0xa8] sm:$0xff]  ;;  %v400_v34 = vld [vmem:[#allocation7 + $0xa0] sm:$0xff] }
  0x2f   :  { %v386_v31 = vld [vmem:[#allocation7 + $0x30] sm:$0xff]  ;;  %v385_v33 = vld [vmem:[#allocation7 + $0x28] sm:$0xff]  ;;  %v384_v35 = vld [vmem:[#allocation7 + $0x20] sm:$0xff] }
  0x30   :  { %v399_v36 = vld [vmem:[#allocation7 + $0x98] sm:$0xff]  ;;  %v398_v38 = vld [vmem:[#allocation7 + $0x90] sm:$0xff]  ;;  %v397_v40 = vld [vmem:[#allocation7 + $0x88] sm:$0xff] }
  0x31   :  { %v383_v37 = vld [vmem:[#allocation7 + $0x18] sm:$0xff]  ;;  %v382_v39 = vld [vmem:[#allocation7 + $0x10] sm:$0xff]  ;;  %v381_v41 = vld [vmem:[#allocation7 + $0x8] sm:$0xff] }
  0x32   :  { %v396_v42 = vld [vmem:[#allocation7 + $0x80] sm:$0xff] }
  0x33   :  { %v380_v43 = vld [vmem:[#allocation7] sm:$0xff] }
  0x34   :  { %v546_v50 = vld [vmem:[%s848_s3] ss:$0 sm:$0xff]  ;;  %s764_s3 = smov [#allocation8]  }
  0x35   :  { %s525_s5 = sshll.u32 %s764_s3, 4  ;;  %s526_s5 = int_to_ptr.vmem [resolvable:$true] %s525_s5 }
  0x36   :  { %s733_s6 = scalar_lea.vmem %s526_s5, 512  ;;  %p738_p2 = scmp.lt.s32.totalorder %s526_s5, %s526_s5 }
  0x37   :  { %p734_p1 = scmp.ne.s32.totalorder %s526_s5, %s733_s6  ;;  %p739_p3 = scmp.lt.s32.totalorder %s733_s6, %s733_s6 }
  0x39   :  { %p740_p4 = por %p739_p3, %p738_p2 }
  0x3b   :  { %p741_p5 = pnand %p740_p4, %p734_p1 }
  0xeb   :  { %v814_v8 = vpop.f32.mrf.mxu0  ;;  %v816_v9 = vpop.f32.mrf.mxu1 }
  0xec   :  { %621 = vmatprep.subr.mxu0 %v814_v8  ;;  %628 = vmatprep.subr.mxu1 %v816_v9 }
  0xed   :  { %v820_v10 = vpop.f32.mrf.mxu0  ;;  %v822_v11 = vpop.f32.mrf.mxu1  ;;  %622 = vmatpush3.msra.mxu0 %v814_v8  ;;  %629 = vmatpush3.msra.mxu1 %v816_v9 }
  0xee   :  { %623 = vmatprep.subr.mxu0 %v820_v10  ;;  %630 = vmatprep.subr.mxu1 %v822_v11 }
  0xef   :  { %624 = vmatpush3.msra.mxu0 %v820_v10  ;;  %631 = vmatpush3.msra.mxu1 %v822_v11 }
  0xf0   :  { %626 = vmatmul.mubr.msk.f32.vlgmr.msra.gmra.mxu0 %vm67_vm0, %v60_v6  ;;  %633 = vmatmul.mubr.msk.f32.vlgmr.msra.gmra.mxu1 %vm67_vm0, %v62_v7 }
  0xf1   :  { %563 = vmatprep.subr.mxu0 %v411_v12  ;;  %635 = vmatprep.subr.mxu1 %v411_v12 }
  0xf2   :  { %564 = vmatpush3.msra.mxu0 %v395_v13  ;;  %651 = vmatpush3.msra.mxu1 %v395_v13 }
  0xf3   :  { %565 = vmatprep.subr.mxu0 %v410_v14  ;;  %636 = vmatprep.subr.mxu1 %v410_v14 }
  0xf4   :  { %566 = vmatpush3.msra.mxu0 %v394_v15  ;;  %652 = vmatpush3.msra.mxu1 %v394_v15 }
  0xf5   :  { %567 = vmatprep.subr.mxu0 %v409_v16  ;;  %637 = vmatprep.subr.mxu1 %v409_v16 }
  0xf6   :  { %568 = vmatpush3.msra.mxu0 %v393_v17  ;;  %653 = vmatpush3.msra.mxu1 %v393_v17 }
  0xf7   :  { %569 = vmatprep.subr.mxu0 %v408_v18  ;;  %638 = vmatprep.subr.mxu1 %v408_v18 }
  0xf8   :  { %570 = vmatpush3.msra.mxu0 %v392_v19  ;;  %654 = vmatpush3.msra.mxu1 %v392_v19 }
  0xf9   :  { %571 = vmatprep.subr.mxu0 %v407_v20  ;;  %639 = vmatprep.subr.mxu1 %v407_v20 }
  0xfa   :  { %572 = vmatpush3.msra.mxu0 %v391_v21  ;;  %655 = vmatpush3.msra.mxu1 %v391_v21 }
  0xfb   :  { %573 = vmatprep.subr.mxu0 %v406_v22  ;;  %640 = vmatprep.subr.mxu1 %v406_v22 }
  0xfc   :  { %574 = vmatpush3.msra.mxu0 %v390_v23  ;;  %656 = vmatpush3.msra.mxu1 %v390_v23 }
  0xfd   :  { %575 = vmatprep.subr.mxu0 %v405_v24  ;;  %641 = vmatprep.subr.mxu1 %v405_v24 }
  0xfe   :  { %576 = vmatpush3.msra.mxu0 %v389_v25  ;;  %657 = vmatpush3.msra.mxu1 %v389_v25 }
  0xff   :  { %577 = vmatprep.subr.mxu0 %v404_v26  ;;  %642 = vmatprep.subr.mxu1 %v404_v26 }
 0x100   :  { %578 = vmatpush3.msra.mxu0 %v388_v27  ;;  %658 = vmatpush3.msra.mxu1 %v388_v27 }
 0x101   :  { %579 = vmatprep.subr.mxu0 %v403_v28  ;;  %643 = vmatprep.subr.mxu1 %v403_v28 }
 0x102   :  { %580 = vmatpush3.msra.mxu0 %v387_v29  ;;  %659 = vmatpush3.msra.mxu1 %v387_v29 }
 0x103   :  { %581 = vmatprep.subr.mxu0 %v402_v30  ;;  %644 = vmatprep.subr.mxu1 %v402_v30 }
 0x104   :  { %582 = vmatpush3.msra.mxu0 %v386_v31  ;;  %660 = vmatpush3.msra.mxu1 %v386_v31 }
 0x105   :  { %583 = vmatprep.subr.mxu0 %v401_v32  ;;  %645 = vmatprep.subr.mxu1 %v401_v32 }
 0x106   :  { %584 = vmatpush3.msra.mxu0 %v385_v33  ;;  %661 = vmatpush3.msra.mxu1 %v385_v33 }
 0x107   :  { %585 = vmatprep.subr.mxu0 %v400_v34  ;;  %646 = vmatprep.subr.mxu1 %v400_v34 }
 0x108   :  { %586 = vmatpush3.msra.mxu0 %v384_v35  ;;  %662 = vmatpush3.msra.mxu1 %v384_v35 }
 0x109   :  { %587 = vmatprep.subr.mxu0 %v399_v36  ;;  %647 = vmatprep.subr.mxu1 %v399_v36 }
 0x10a   :  { %588 = vmatpush3.msra.mxu0 %v383_v37  ;;  %663 = vmatpush3.msra.mxu1 %v383_v37 }
 0x10b   :  { %589 = vmatprep.subr.mxu0 %v398_v38  ;;  %648 = vmatprep.subr.mxu1 %v398_v38 }
 0x10c   :  { %590 = vmatpush3.msra.mxu0 %v382_v39  ;;  %664 = vmatpush3.msra.mxu1 %v382_v39 }
 0x10d   :  { %591 = vmatprep.subr.mxu0 %v397_v40  ;;  %649 = vmatprep.subr.mxu1 %v397_v40 }
 0x10e   :  { %592 = vmatpush3.msra.mxu0 %v381_v41  ;;  %665 = vmatpush3.msra.mxu1 %v381_v41 }
 0x10f   :  { %593 = vmatprep.subr.mxu0 %v396_v42  ;;  %650 = vmatprep.subr.mxu1 %v396_v42 }
 0x110   :  { %594 = vmatpush3.msra.mxu0 %v380_v43  ;;  %666 = vmatpush3.msra.mxu1 %v380_v43 }
 0x1b0   :  { %v627_v44 = vpop.f32.mrf.mxu0  ;;  %v634_v45 = vpop.f32.mrf.mxu1 }
 0x1b2   :  { %v296_v46 = vpop.f32.mrf.mxu0  ;;  %v371_v47 = vpop.f32.mrf.mxu1 }
 0x1b3   :  { %483 = vmatprep.mubr.f32.mxu0 %v296_v46  ;;  %493 = vmatprep.mubr.f32.mxu1 %v371_v47 }
 0x1b4   :  { %484 = vmatmul.mubr.f32.vlgmr.msra.gmra.mxu0 %v820_v10  ;;  %494 = vmatmul.mubr.f32.vlgmr.msra.gmra.mxu1 %v822_v11 }
 0x1b5   :  { %488 = vmatprep.mubr.f32.mxu0 %v627_v44  ;;  %498 = vmatprep.mubr.f32.mxu1 %v634_v45 }
 0x1b8   :  { %489 = vmatmul.mubr.f32.gmra.mxu0 %v814_v8  ;;  %499 = vmatmul.mubr.f32.gmra.mxu1 %v816_v9 }
 0x274   :  { %v595_v48 = vpop.f32.mrf.mxu0  ;;  %v601_v49 = vpop.f32.mrf.mxu1 }
 0x276   :  { %v596_v51 = vpop.f32.mrf.mxu0  ;;  %v602_v52 = vpop.f32.mrf.mxu1 }
 0x277   :  { %v597_v53 = vadd.f32 %v596_v51, %v595_v48  ;;  %v603_v54 = vadd.f32 %v602_v52, %v601_v49 }
 0x278   :  { %v598_v55 = vpop.f32.mrf.mxu0  ;;  %v604_v56 = vpop.f32.mrf.mxu1 }
 0x279   :  { %v486_v57 = vadd.f32 %v597_v53, %v546_v50  ;;  %v496_v58 = vadd.f32 %v603_v54, %v546_v50 }
 0x27a   :  { %v599_v59 = vpop.f32.mrf.mxu0  ;;  %v605_v60 = vpop.f32.mrf.mxu1 }
 0x27b   :  { %vm504_vm1 = vcmp.gt.f32.partialorder %v486_v57, 0.0  ;;  %v508_v61 = vmul.f32 0.01, %v486_v57  ;;  %vm506_vm2 = vcmp.gt.f32.partialorder %v496_v58, 0.0  ;;  %v510_v62 = vmul.f32 0.01, %v496_v58 }
 0x27c   :  { %v600_v63 = vadd.f32 %v599_v59, %v598_v55  ;;  %v606_v0 = vadd.f32 %v605_v60, %v604_v56 }
 0x27d   :  { %v512_v1 = vsel %vm504_vm1, %v486_v57, %v508_v61  ;;  %v514_v2 = vsel %vm506_vm2, %v496_v58, %v510_v62 }
 0x27e   :  { %516 = vst [vmem:[#allocation8] sm:$0xff] %v512_v1  ;;  %518 = vst [vmem:[#allocation8 + $0x10] sm:$0xff] %v514_v2  ;;  %v491_v3 = vadd.f32 %v600_v63, %v546_v50  ;;  %v501_v4 = vadd.f32 %v606_v0, %v546_v50 }
 0x280   :  { %vm505_vm3 = vcmp.gt.f32.partialorder %v491_v3, 0.0  ;;  %v509_v5 = vmul.f32 0.01, %v491_v3  ;;  %vm507_vm4 = vcmp.gt.f32.partialorder %v501_v4, 0.0  ;;  %v511_v6 = vmul.f32 0.01, %v501_v4 }
 0x282   :  { %v513_v7 = vsel %vm505_vm3, %v491_v3, %v509_v5  ;;  %v515_v8 = vsel %vm507_vm4, %v501_v4, %v511_v6 }
 0x283   :  { %517 = vst [vmem:[#allocation8 + $0x8] sm:$0xff] %v513_v7  ;;  %519 = vst [vmem:[#allocation8 + $0x18] sm:$0xff] %v515_v8 }
 0x284   :  { %744 = shalt.err (!%p741_p5)
}
 0x285   :  { %531 = dma.vmem_to_hbm [thread:$0]  %s526_s5, 512, %s849_s4, [#allocation4], %s761_s20, %s761_s20, %s762_s21  }
 0x286   :  { %757 = dma.done.wait [#allocation4], 512  }
 0x287   :  { %758 = vsyncadd [#allocation4], 4294966784 }
 0x288   :  { %535 = vsyncpa [#allocation3], 1 }
 0x289   :  { %536 = vsyncpa [#allocation6], 1 }
 0x28a   :  { %537 = vsyncpa [#allocation4], 1 }

</bundles_post_ra>
